<compile_context>
chip_gen: v7x
topology: tpu7x:2x2x1
jax: 0.10.0
libtpu: 0.0.40
codegen_flags: <defaults>
</compile_context>

<pallas_src>
import jax
import jax.numpy as jnp
from jax import lax
from jax.experimental import pallas as pl
from jax.experimental.pallas import tpu as pltpu

FEAT = 512          # resnet / gat / lstm feature width
HIDDEN = 512        # LSTM hidden size
K_CLASS = 4         # config.k_class
TISSUE_CLASS = 5    # config.tissue_class  (tc output = TISSUE_CLASS + 1)


# ---------------------------------------------------------------------------
# Kernel 1: feature extractor stand-in for resnet18 (GAP + projection to 512)
#           images are fed lane-dense as (N, C, H*W); tissue + bag share one
#           call / one grid step.
# ---------------------------------------------------------------------------
def _feat_kernel(img_ref, w_ref, b_ref, o_ref):
    x = img_ref[...]                                   # (M, C, HW)
    inv_hw = 1.0 / float(x.shape[-1])
    acc = b_ref[...]                                   # (1, FEAT) -> broadcast
    # per-channel GAP (lane reduction) + VPU broadcast-FMA projection; keeps
    # the 3-wide channel axis off the lanes / MXU entirely.
    for c in range(x.shape[1]):
        chan_mean = jnp.sum(x[:, c, :], axis=-1, keepdims=True) * inv_hw  # (M, 1)
        acc = acc + chan_mean * w_ref[c:c + 1, :]                          # (M, FEAT)
    o_ref[...] = acc


def extract_features(imgs_flat, w, b):
    m = imgs_flat.shape[0]
    return pl.pallas_call(
        _feat_kernel,
        out_shape=jax.ShapeDtypeStruct((m, FEAT), jnp.float32),
    )(imgs_flat, w, b)


# ---------------------------------------------------------------------------
# Kernel 2: size_embed (Linear(2,16)+ReLU) + merge Linear(528,512)
#           + dropout(p=0.5, training=True); runs on flattened (B*N, 512).
# ---------------------------------------------------------------------------
def _merge_kernel(feat_ref, size_ref, sew_ref, seb_ref, wf_ref, ws_ref, b_ref,
                  mask_ref, o_ref):
    sz = size_ref[...]                                 # (M, 2)
    # 2->16 linear as two VPU broadcast-FMAs (no MXU for K=2)
    se = sz[:, 0:1] * sew_ref[0:1, :] + sz[:, 1:2] * sew_ref[1:2, :] + seb_ref[...]
    se = jnp.maximum(se, 0.0)                          # ReLU, (M, 16)
    merged = (jnp.dot(feat_ref[...].astype(jnp.bfloat16), wf_ref[...],
                      preferred_element_type=jnp.float32)
              + jnp.dot(se, ws_ref[...], preferred_element_type=jnp.float32)
              + b_ref[...])
    o_ref[...] = merged * mask_ref[...]                # dropout (mask in {0, 2})


def merge_features(mask_feats, cell_size_flat, params, drop_mask):
    m = mask_feats.shape[0]
    return pl.pallas_call(
        _merge_kernel,
        out_shape=jax.ShapeDtypeStruct((m, FEAT), jnp.float32),
    )(mask_feats, cell_size_flat, params['se_w'], params['se_b'],
      params['merge_wf'].astype(jnp.bfloat16), params['merge_ws'],
      params['merge_b'], drop_mask)


# ---------------------------------------------------------------------------
# Kernel 3: GraphAttentionLayer (concat=False).  Scores are built directly in
#           transposed orientation so softmax(dim=1) becomes a lane-axis
#           softmax; adj is passed pre-transposed from the host.
# ---------------------------------------------------------------------------
def _gat_kernel(h_ref, adjt_ref, mask_ref, w_ref, a1_ref, a2_ref, o_ref):
    h = h_ref[0]                                                     # (N, F)
    wh = jnp.dot(h.astype(jnp.bfloat16), w_ref[...],
                 preferred_element_type=jnp.float32)                 # (N, F)
    # Wh2 as a column vector (lane reduction), Wh1 as a row vector.
    c2 = jnp.sum(wh * a2_ref[...], axis=-1, keepdims=True)           # (N, 1)
    c1 = lax.dot_general(a1_ref[...], wh, (((1,), (1,)), ((), ())),
                         preferred_element_type=jnp.float32)         # (1, N)
    # transposed scores: eT[j, i] = e[i, j] = LeakyReLU(Wh1[i] + Wh2[j])
    et = c2 + c1
    et = jnp.where(et > 0, et, 0.2 * et)                             # LeakyReLU
    att = jnp.where(adjt_ref[0] > 0, et, jnp.full_like(et, -9.0e15))
    # softmax over original dim=1 -> lane axis of the transposed scores
    m = jnp.max(att, axis=-1, keepdims=True)
    p = jnp.exp(att - m)
    att = p / jnp.sum(p, axis=-1, keepdims=True)
    att = att * mask_ref[0]                                          # dropout
    # h'[i] = sum_j att[i, j] * Wh[j] = sum_j attT[j, i] * Wh[j]
    o_ref[0] = lax.dot_general(att, wh, (((0,), (0,)), ((), ())),
                               preferred_element_type=jnp.float32)   # no ELU


def gat_layer(h, adj_t, params, drop_mask):
    b, n, f = h.shape
    return pl.pallas_call(
        _gat_kernel,
        out_shape=jax.ShapeDtypeStruct((b, n, FEAT), jnp.float32),
        grid=(b,),
        in_specs=[
            pl.BlockSpec((1, n, f), lambda i: (i, 0, 0)),
            pl.BlockSpec((1, n, n), lambda i: (i, 0, 0)),
            pl.BlockSpec((1, n, n), lambda i: (i, 0, 0)),
            pl.BlockSpec((f, FEAT), lambda i: (0, 0)),
            pl.BlockSpec((1, FEAT), lambda i: (0, 0)),
            pl.BlockSpec((1, FEAT), lambda i: (0, 0)),
        ],
        out_specs=pl.BlockSpec((1, n, FEAT), lambda i: (i, 0, 0)),
        compiler_params=pltpu.CompilerParams(
            dimension_semantics=("parallel",)),
    )(h, adj_t, drop_mask, params['gat_w'].astype(jnp.bfloat16),
      params['gat_a1'], params['gat_a2'])


# ---------------------------------------------------------------------------
# Kernel 4: single-layer LSTM (seq_len=2) + output dropout + both heads
#           (tc linear on dropped h1 of cell 0; predict linear+softmax on
#           dropped h2 of all cells).  Timestep 0 is shared across the cells
#           of a batch, so it is computed once as a (1, H) row.
# ---------------------------------------------------------------------------
def _lstm_head_kernel(graph_ref, glob_ref, mask_ref, wih_ref, whh_ref, b_ref,
                      tcw_ref, tcb_ref, pw_ref, pb_ref,
                      out_ref, tc_ref, prob_ref):
    hsz = HIDDEN
    x1 = graph_ref[0]                                # (N, F)
    g = glob_ref[0]                                  # (1, F)

    def gates(z):
        i = jax.nn.sigmoid(z[:, 0 * hsz:1 * hsz])
        f = jax.nn.sigmoid(z[:, 1 * hsz:2 * hsz])
        gg = jnp.tanh(z[:, 2 * hsz:3 * hsz])
        o = jax.nn.sigmoid(z[:, 3 * hsz:4 * hsz])
        return i, f, gg, o

    # timestep 0: input = global feature, zero state -> identical for all cells
    z0 = (jnp.dot(g.astype(jnp.bfloat16), wih_ref[...],
                  preferred_element_type=jnp.float32) + b_ref[...])   # (1, 4H)
    i0, _, g0, o0 = gates(z0)
    c1 = i0 * g0                                     # (1, H)
    h1 = o0 * jnp.tanh(c1)                           # (1, H)

    # timestep 1: input = per-cell graph feature
    z1 = (jnp.dot(x1.astype(jnp.bfloat16), wih_ref[...],
                  preferred_element_type=jnp.float32)
          + jnp.dot(h1.astype(jnp.bfloat16), whh_ref[...],
                    preferred_element_type=jnp.float32)
          + b_ref[...])                              # (N, 4H)
    i1, f1, g1, o1 = gates(z1)
    c2 = f1 * c1 + i1 * g1                           # broadcast (1,H) state
    h2 = o1 * jnp.tanh(c2)                           # (N, H)

    n = x1.shape[0]
    h1b = jnp.broadcast_to(h1, (n, hsz))
    # one lane-dense store of both timesteps, dropout fused (mask in {0, 2})
    seq_out = jnp.concatenate([h1b, h2], axis=-1) * mask_ref[0]       # (N, 2H)
    out_ref[0] = seq_out

    # tissue-class head on dropped h1 of cell 0
    tc_in = seq_out[0:1, :hsz]
    tc_ref[0] = (jnp.dot(tc_in, tcw_ref[...],
                         preferred_element_type=jnp.float32) + tcb_ref[...])

    # prediction head (+ softmax) on dropped h2 of all cells
    logits = (jnp.dot(seq_out[:, hsz:], pw_ref[...],
                      preferred_element_type=jnp.float32) + pb_ref[...])
    m = jnp.max(logits, axis=-1, keepdims=True)
    e = jnp.exp(logits - m)
    prob_ref[0] = e / jnp.sum(e, axis=-1, keepdims=True)


def lstm_and_heads(graph_feats, global_feat_b1f, params, drop_mask):
    b, n, f = graph_feats.shape
    return pl.pallas_call(
        _lstm_head_kernel,
        out_shape=(
            jax.ShapeDtypeStruct((b, n, 2 * FEAT), jnp.float32),
            jax.ShapeDtypeStruct((b, 1, TISSUE_CLASS + 1), jnp.float32),
            jax.ShapeDtypeStruct((b, n, K_CLASS), jnp.float32),
        ),
        grid=(b,),
        in_specs=[
            pl.BlockSpec((1, n, f), lambda i: (i, 0, 0)),
            pl.BlockSpec((1, 1, f), lambda i: (i, 0, 0)),
            pl.BlockSpec((1, n, 2 * FEAT), lambda i: (i, 0, 0)),
            pl.BlockSpec((FEAT, 4 * HIDDEN), lambda i: (0, 0)),
            pl.BlockSpec((HIDDEN, 4 * HIDDEN), lambda i: (0, 0)),
            pl.BlockSpec((1, 4 * HIDDEN), lambda i: (0, 0)),
            pl.BlockSpec((FEAT, TISSUE_CLASS + 1), lambda i: (0, 0)),
            pl.BlockSpec((1, TISSUE_CLASS + 1), lambda i: (0, 0)),
            pl.BlockSpec((FEAT, K_CLASS), lambda i: (0, 0)),
            pl.BlockSpec((1, K_CLASS), lambda i: (0, 0)),
        ],
        out_specs=(
            pl.BlockSpec((1, n, 2 * FEAT), lambda i: (i, 0, 0)),
            pl.BlockSpec((1, 1, TISSUE_CLASS + 1), lambda i: (i, 0, 0)),
            pl.BlockSpec((1, n, K_CLASS), lambda i: (i, 0, 0)),
        ),
        compiler_params=pltpu.CompilerParams(
            dimension_semantics=("parallel",),
            vmem_limit_bytes=32 * 1024 * 1024),
    )(graph_feats, global_feat_b1f, drop_mask,
      params['lstm_wih'].astype(jnp.bfloat16),
      params['lstm_whh'].astype(jnp.bfloat16), params['lstm_b'],
      params['tc_w'], params['tc_b'], params['pred_w'], params['pred_b'])


# ---------------------------------------------------------------------------
# Parameter init (deterministic, synthetic), dropout masks, forward glue
# ---------------------------------------------------------------------------
def init_params(key):
    ks = jax.random.split(key, 12)

    def nrm(k, shape, fan_in):
        return jax.random.normal(k, shape, jnp.float32) / jnp.sqrt(float(fan_in))

    return {
        'feat_w': nrm(ks[0], (3, FEAT), 3),
        'feat_b': jnp.zeros((1, FEAT), jnp.float32),
        'se_w': nrm(ks[1], (2, 16), 2),
        'se_b': jnp.zeros((1, 16), jnp.float32),
        'merge_wf': nrm(ks[2], (FEAT, FEAT), FEAT + 16),
        'merge_ws': nrm(ks[3], (16, FEAT), FEAT + 16),
        'merge_b': jnp.zeros((1, FEAT), jnp.float32),
        'gat_w': nrm(ks[4], (FEAT, FEAT), FEAT),
        'gat_a1': nrm(ks[5], (1, FEAT), FEAT),
        'gat_a2': nrm(ks[6], (1, FEAT), FEAT),
        'lstm_wih': nrm(ks[7], (FEAT, 4 * HIDDEN), FEAT),
        'lstm_whh': nrm(ks[8], (HIDDEN, 4 * HIDDEN), HIDDEN),
        'lstm_b': jnp.zeros((1, 4 * HIDDEN), jnp.float32),
        'pred_w': nrm(ks[9], (FEAT, K_CLASS), FEAT),
        'pred_b': jnp.zeros((1, K_CLASS), jnp.float32),
        'tc_w': nrm(ks[10], (FEAT, TISSUE_CLASS + 1), FEAT),
        'tc_b': jnp.zeros((1, TISSUE_CLASS + 1), jnp.float32),
    }


def make_dropout_masks(key, batch, cells):
    """Dropout keep masks with scale 1/(1-p) = 2.0 folded in (p = 0.5)."""
    k1, k2, k3 = jax.random.split(key, 3)
    def mask(k, shape):
        return jax.random.bernoulli(k, 0.5, shape).astype(jnp.float32) * 2.0
    return {
        'merge': mask(k1, (batch * cells, FEAT)),
        'gat': mask(k2, (batch, cells, cells)),
        'lstm': mask(k3, (batch, cells, 2 * FEAT)),
    }


def histocell_forward(params, drop_masks, tissue_nchw, bag_nchw, adj,
                      cell_size, valid_mask, raw_size):
    batch = raw_size['batch']
    cells = raw_size['cells']
    nb, c, h, w = bag_nchw.shape
    nt = tissue_nchw.shape[0]

    # layout: NCHW -> (N, C, H*W)  (lane dim = H*W, dense); one feature call
    # covers both the bag crops and the tissue image.
    imgs = jnp.concatenate(
        [bag_nchw.reshape(nb, c, h * w), tissue_nchw.reshape(nt, c, h * w)],
        axis=0).astype(jnp.float32)
    feats = extract_features(imgs, params['feat_w'], params['feat_b'])
    mask_feats = feats[:nb]                                  # (B*N, 512)
    global_feat = feats[nb:]                                 # (B, 512)

    dmask_feats = merge_features(
        mask_feats, cell_size.reshape(batch * cells, 2).astype(jnp.float32),
        params, drop_masks['merge'])
    dmask_feats = dmask_feats.reshape(batch, cells, FEAT)

    adj_t = jnp.swapaxes(adj, 1, 2)                          # transposed adjacency
    graph_feats = gat_layer(dmask_feats, adj_t, params, drop_masks['gat'])

    # LSTM consumes global_feat and graph_feats directly (no HBM stack).
    out, tc_out, probs = lstm_and_heads(
        graph_feats, global_feat.reshape(batch, 1, FEAT), params,
        drop_masks['lstm'])

    dout = out.reshape(batch, cells, 2, FEAT)                # already dropped
    tissue_cat = tc_out.reshape(batch, TISSUE_CLASS + 1)
    cell_emb = dout[:, :, 1, :]

    prop_list, prob_list, cell_features = [], [], []
    for b in range(batch):
        v = int(valid_mask[b])
        if v <= 0:
            continue
        prop_list.append(jnp.mean(probs[b, :v], axis=0))
        prob_list.append(probs[b, :v])
        cell_features.append(cell_emb[b, :v])
    avg_probs = jnp.stack(prop_list, axis=0)
    return prob_list, avg_probs, tissue_cat, cell_features


if __name__ == "__main__":
    key = jax.random.PRNGKey(0)
    kp, kt, kb, ka, kc, kd = jax.random.split(key, 6)

    B, N, C, H, W = 2, 8, 3, 16, 16
    params = init_params(kp)

    tissue = jax.random.normal(kt, (B, C, H, W), jnp.float32)
    bag = jax.random.normal(kb, (B * N, C, H, W), jnp.float32)
    adj = (jax.random.uniform(ka, (B, N, N)) > 0.5).astype(jnp.float32)
    adj = jnp.maximum(adj, jnp.eye(N, dtype=jnp.float32)[None])   # self loops
    cell_size = jax.random.uniform(kc, (B, N, 2), jnp.float32)
    valid_mask = [5, 8]
    raw_size = {'batch': B, 'cells': N}
    drop_masks = make_dropout_masks(kd, B, N)

    prob_list, avg_probs, tissue_cat, cell_features = histocell_forward(
        params, drop_masks, tissue, bag, adj, cell_size, valid_mask, raw_size)

    jax.block_until_ready((prob_list, avg_probs, tissue_cat, cell_features))

    assert avg_probs.shape == (2, K_CLASS)
    assert tissue_cat.shape == (B, TISSUE_CLASS + 1)
    assert prob_list[0].shape == (5, K_CLASS)
    assert cell_features[1].shape == (8, FEAT)
    assert bool(jnp.isfinite(avg_probs).all()) and bool(jnp.isfinite(tissue_cat).all())
    print("KERNEL_OK")
</pallas_src>

<mosaic_0001>
module attributes {stable_mosaic.version = 11 : i64} {
  func.func @_feat_kernel(%arg0: memref<18x3x256xf32, #tpu.memory_space<vmem>>, %arg1: memref<3x512xf32, #tpu.memory_space<vmem>>, %arg2: memref<1x512xf32, #tpu.memory_space<vmem>>, %arg3: memref<18x512xf32, #tpu.memory_space<vmem>>) attributes {dimension_semantics = [], scalar_prefetch = 0 : i64, scratch_operands = 0 : i64, tpu.core_type = #tpu.core_type<tc>} {
    %c0 = arith.constant 0 : index
    %c0_0 = arith.constant 0 : index
    %c0_1 = arith.constant 0 : index
    %0 = vector.load %arg0[%c0, %c0_0, %c0_1] : memref<18x3x256xf32, #tpu.memory_space<vmem>>, vector<18x3x256xf32>
    %c0_2 = arith.constant 0 : index
    %c0_3 = arith.constant 0 : index
    %1 = vector.load %arg2[%c0_2, %c0_3] : memref<1x512xf32, #tpu.memory_space<vmem>>, vector<1x512xf32>
    %2 = vector.extract_strided_slice %0 {offsets = [0, 0, 0], sizes = [18, 1, 256], strides = [1, 1, 1]} : vector<18x3x256xf32> to vector<18x1x256xf32>
    %3 = vector.shape_cast %2 : vector<18x1x256xf32> to vector<18x256xf32>
    %cst = arith.constant dense<0.000000e+00> : vector<18xf32>
    %4 = vector.multi_reduction <add>, %3, %cst [1] : vector<18x256xf32> to vector<18xf32>
    %5 = vector.shape_cast %4 : vector<18xf32> to vector<18x1xf32>
    %cst_4 = arith.constant 3.906250e-03 : f32
    %6 = vector.broadcast %cst_4 : f32 to vector<18x1xf32>
    %7 = arith.mulf %5, %6 : vector<18x1xf32>
    %c0_5 = arith.constant 0 : index
    %c0_6 = arith.constant 0 : index
    %8 = vector.load %arg1[%c0_5, %c0_6] : memref<3x512xf32, #tpu.memory_space<vmem>>, vector<1x512xf32>
    %9 = vector.broadcast %7 : vector<18x1xf32> to vector<18x512xf32>
    %10 = vector.broadcast %8 : vector<1x512xf32> to vector<18x512xf32>
    %11 = arith.mulf %9, %10 : vector<18x512xf32>
    %12 = vector.broadcast %1 : vector<1x512xf32> to vector<18x512xf32>
    %13 = arith.addf %12, %11 : vector<18x512xf32>
    %14 = vector.extract_strided_slice %0 {offsets = [0, 1, 0], sizes = [18, 1, 256], strides = [1, 1, 1]} : vector<18x3x256xf32> to vector<18x1x256xf32>
    %15 = vector.shape_cast %14 : vector<18x1x256xf32> to vector<18x256xf32>
    %cst_7 = arith.constant dense<0.000000e+00> : vector<18xf32>
    %16 = vector.multi_reduction <add>, %15, %cst_7 [1] : vector<18x256xf32> to vector<18xf32>
    %17 = vector.shape_cast %16 : vector<18xf32> to vector<18x1xf32>
    %cst_8 = arith.constant 3.906250e-03 : f32
    %18 = vector.broadcast %cst_8 : f32 to vector<18x1xf32>
    %19 = arith.mulf %17, %18 : vector<18x1xf32>
    %c1 = arith.constant 1 : index
    %c0_9 = arith.constant 0 : index
    %20 = vector.load %arg1[%c1, %c0_9] : memref<3x512xf32, #tpu.memory_space<vmem>>, vector<1x512xf32>
    %21 = vector.broadcast %19 : vector<18x1xf32> to vector<18x512xf32>
    %22 = vector.broadcast %20 : vector<1x512xf32> to vector<18x512xf32>
    %23 = arith.mulf %21, %22 : vector<18x512xf32>
    %24 = arith.addf %13, %23 : vector<18x512xf32>
    %25 = vector.extract_strided_slice %0 {offsets = [0, 2, 0], sizes = [18, 1, 256], strides = [1, 1, 1]} : vector<18x3x256xf32> to vector<18x1x256xf32>
    %26 = vector.shape_cast %25 : vector<18x1x256xf32> to vector<18x256xf32>
    %cst_10 = arith.constant dense<0.000000e+00> : vector<18xf32>
    %27 = vector.multi_reduction <add>, %26, %cst_10 [1] : vector<18x256xf32> to vector<18xf32>
    %28 = vector.shape_cast %27 : vector<18xf32> to vector<18x1xf32>
    %cst_11 = arith.constant 3.906250e-03 : f32
    %29 = vector.broadcast %cst_11 : f32 to vector<18x1xf32>
    %30 = arith.mulf %28, %29 : vector<18x1xf32>
    %c2 = arith.constant 2 : index
    %c0_12 = arith.constant 0 : index
    %31 = vector.load %arg1[%c2, %c0_12] : memref<3x512xf32, #tpu.memory_space<vmem>>, vector<1x512xf32>
    %32 = vector.broadcast %30 : vector<18x1xf32> to vector<18x512xf32>
    %33 = vector.broadcast %31 : vector<1x512xf32> to vector<18x512xf32>
    %34 = arith.mulf %32, %33 : vector<18x512xf32>
    %35 = arith.addf %24, %34 : vector<18x512xf32>
    %c0_13 = arith.constant 0 : index
    %c0_14 = arith.constant 0 : index
    %36 = vector.load %arg3[%c0_13, %c0_14] : memref<18x512xf32, #tpu.memory_space<vmem>>, vector<18x512xf32>
    tpu.vector_store %arg3[%c0_13, %c0_14], %35 {strides = array<i32>} : memref<18x512xf32, #tpu.memory_space<vmem>>, vector<18x512xf32>,
    return
  }
}

</mosaic_0001>

<bundles_post_ra>
// kernel: tpu_custom_call.1
= control target key start
LH: loop header
LB: loop body
LE: loop exit
PB: predicated region body
PF: predicated region fallthrough
CT: control target
= control target key end

     0   :  { %8 = vsyncpa [#allocation3], 0  ;;  %s1627_s0 = inlined_call_operand.hbm [shape: f32[18,3,256], index: 0, kind: input, shape index: {}]   ;;  %s1628_s1 = inlined_call_operand.hbm [shape: f32[3,512], index: 1, kind: input, shape index: {}]   ;;  %s1629_s2 = inlined_call_operand.vmem [shape: f32[1,512], index: 2, kind: input, shape index: {}]   ;;  %s1630_s3 = inlined_call_operand.hbm [shape: f32[18,512], index: 3, kind: output, shape index: {}]  }
   0x1   :  { %9 = vsyncpa [#allocation6], 0 }
   0x2   :  { %10 = vsyncpa [#allocation4], 0  ;;  %s1036_s12 = smov [#allocation2]   ;;  %s964_s16 = scalar_lea.hbm %s1627_s0, 2304 }
   0x3   :  { %s16_s13 = sshll.u32 %s1036_s12, 4  ;;  %p965_p0 = scmp.ne.s32.totalorder %s1627_s0, %s964_s16  ;;  %s17_s13 = int_to_ptr.vmem [resolvable:$true] %s16_s13 }
   0x4   :  { %p968_p1 = scmp.lt.u32.totalorder %s964_s16, %s1627_s0 }
   0x6   :  { %p970_p2 = pnand %p968_p1, %p965_p0 }
   0x8   :  { %973 = shalt.err (!%p970_p2)
}
   0x9   :  { %s974_s21 = scalar_lea.vmem %s17_s13, 2304  ;;  %p979_p4 = scmp.lt.s32.totalorder %s17_s13, %s17_s13 }
   0xa   :  { %p975_p3 = scmp.ne.s32.totalorder %s17_s13, %s974_s21  ;;  %p980_p5 = scmp.lt.s32.totalorder %s974_s21, %s974_s21 }
   0xc   :  { %p981_p6 = por %p980_p5, %p979_p4 }
   0xe   :  { %p982_p7 = pnand %p981_p6, %p975_p3 }
  0x10   :  { %985 = shalt.err (!%p982_p7)
}
  0x11   :  { %s1037_s22 = smov 128   ;;  %s1038_s23 = smov 8  }
  0x12   :  { %22 = dma.hbm_to_vmem [thread:$0]  %s1627_s0, 2304, %s17_s13, [#allocation3], %s1037_s22, %s1037_s22, %s1038_s23  }
  0x13   :  { %s1039_s26 = smov [#allocation5]   ;;  %s986_s30 = scalar_lea.hbm %s1628_s1, 256 }
  0x14   :  { %s29_s27 = sshll.u32 %s1039_s26, 4  ;;  %p987_p8 = scmp.ne.s32.totalorder %s1628_s1, %s986_s30  ;;  %s30_s27 = int_to_ptr.vmem [resolvable:$true] %s29_s27 }
  0x15   :  { %p990_p9 = scmp.lt.u32.totalorder %s986_s30, %s1628_s1 }
  0x17   :  { %p992_p10 = pnand %p990_p9, %p987_p8 }
  0x19   :  { %995 = shalt.err (!%p992_p10)
}
  0x1a   :  { %s996_s8 = scalar_lea.vmem %s30_s27, 256  ;;  %p1001_p12 = scmp.lt.s32.totalorder %s30_s27, %s30_s27 }
  0x1b   :  { %p997_p11 = scmp.ne.s32.totalorder %s30_s27, %s996_s8  ;;  %p1002_p13 = scmp.lt.s32.totalorder %s996_s8, %s996_s8 }
  0x1d   :  { %p1003_p0 = por %p1002_p13, %p1001_p12 }
  0x1f   :  { %p1004_p1 = pnand %p1003_p0, %p997_p11 }
  0x21   :  { %1007 = shalt.err (!%p1004_p1)
}
  0x22   :  { %32 = dma.hbm_to_vmem [thread:$0]  %s1628_s1, 256, %s30_s27, [#allocation6]  }
  0x23   :  { %1030 = dma.done.wait [#allocation3], 2304  }
  0x24   :  { %1031 = vsyncadd [#allocation3], 4294964992 }
  0x25   :  { %1032 = dma.done.wait [#allocation6], 256  }
  0x26   :  { %1033 = vsyncadd [#allocation6], 4294967040  ;;  %v78_v0 = vlaneseq  ;;  %vm222_vm0 = vcmask 1041409   ;;  %vm271_vm1 = vcmask 1041408   ;;  %vm224_vm2 = vcmask 1042434  }
  0x27   :  { %vm536_vm3 = vcmask 1042432   ;;  %vm226_vm4 = vcmask 1043459   ;;  %vm228_vm5 = vcmask 1044484   ;;  %v1107_v8 = vld [vmem:[#allocation2 + $0x80] sm:$0x77]  ;;  %vm230_vm6 = vcmask 1045509  }
  0x28   :  { %v1087_v1 = vshrl.u32 %v78_v0, 7  ;;  %v1109_v9 = vld [vmem:[#allocation2 + $0x88] sm:$0x77]  ;;  %v1111_v10 = vld [vmem:[#allocation2 + $0x78] sm:$0x77]  ;;  %vm232_vm7 = vcmask 1046534  }
  0x29   :  { %v1129_v19 = vld [vmem:[#allocation2] sm:$0x77]  ;;  %vm234_vm8 = vcmask 1047559   ;;  %v1137_v24 = vld [vmem:[#allocation2 + $0x8] sm:$0x77]  ;;  %vm817_vm9 = vcmask 1047554  }
  0x2a   :  { %v1090_v2 = vsub.s32 0, %v1087_v1  ;;  %v1093_v3 = vsub.s32 4, %v1087_v1  ;;  %v1096_v4 = vsub.s32 1, %v1087_v1  ;;  %v1099_v5 = vsub.s32 5, %v1087_v1  ;;  %v1143_v29 = vld [vmem:[#allocation2 + $0x10] sm:$0x77] }
  0x2b   :  { %v1102_v6 = vsub.s32 2, %v1087_v1  ;;  %v1105_v7 = vsub.s32 6, %v1087_v1  ;;  %v1147_v33 = vld [vmem:[#allocation2 + $0x18] sm:$0x77]  ;;  %v1149_v34 = vld [vmem:[#allocation2 + $0x20] sm:$0x77] }
  0x2c   :  { %v209_v11 = vrot.slane %v1107_v8, %v1090_v2  ;;  %v213_v12 = vrot.slane %v1107_v8, %v1093_v3  ;;  %v217_v13 = vrot.slane %v1109_v9, %v1090_v2  ;;  %v221_v14 = vrot.slane %v1109_v9, %v1093_v3  ;;  %v1155_v38 = vld [vmem:[#allocation2 + $0x28] sm:$0x77]  ;;  %v1195_v63 = vld [vmem:[#allocation2 + $0x30] sm:$0x77] }
  0x2d   :  { %v470_v15 = vrot.slane %v1111_v10, %v1096_v4  ;;  %v474_v16 = vrot.slane %v1111_v10, %v1099_v5  ;;  %v478_v17 = vrot.slane %v1107_v8, %v1096_v4  ;;  %v482_v18 = vrot.slane %v1107_v8, %v1099_v5 }
  0x2e   :  { %v257_v20 = vsel %vm222_vm0, %v217_v13, %v209_v11  ;;  %v258_v21 = vsel %vm222_vm0, %v221_v14, %v213_v12  ;;  %v486_v22 = vrot.slane %v1109_v9, %v1096_v4  ;;  %v490_v23 = vrot.slane %v1109_v9, %v1099_v5 }
  0x2f   :  { %v272_v25 = vsel %vm271_vm1, %v257_v20, 0.0  ;;  %v273_v26 = vsel %vm271_vm1, %v258_v21, 0.0  ;;  %v517_v27 = vsel %vm222_vm0, %v478_v17, %v470_v15  ;;  %v519_v28 = vsel %vm222_vm0, %v482_v18, %v474_v16 }
  0x30   :  { %v274_v30 = vadd.f32 %v273_v26, %v272_v25  ;;  %v518_v31 = vsel %vm224_vm2, %v486_v22, %v517_v27  ;;  %v520_v32 = vsel %vm224_vm2, %v490_v23, %v519_v28  ;;  %v640_v35 = vrot.slane %v1129_v19, %v1102_v6 }
  0x31   :  { %v537_v36 = vsel %vm536_vm3, %v518_v31, 0.0  ;;  %v538_v37 = vsel %vm536_vm3, %v520_v32, 0.0  ;;  %v644_v39 = vrot.slane %v1129_v19, %v1105_v7  ;;  %v648_v40 = vrot.slane %v1137_v24, %v1102_v6 }
  0x32   :  { %275 = vadd.xlane.f32.xlu1 %v274_v30  ;;  %v539_v41 = vadd.f32 %v538_v37, %v537_v36  ;;  %v652_v42 = vrot.slane %v1137_v24, %v1105_v7  ;;  %v656_v43 = vrot.slane %v1143_v29, %v1102_v6  ;;  %v660_v44 = vrot.slane %v1143_v29, %v1105_v7 }
  0x33   :  { %v664_v45 = vrot.slane %v1147_v33, %v1102_v6  ;;  %v668_v46 = vrot.slane %v1147_v33, %v1105_v7  ;;  %v672_v47 = vrot.slane %v1149_v34, %v1102_v6  ;;  %v676_v48 = vrot.slane %v1149_v34, %v1105_v7 }
  0x34   :  { %v680_v49 = vrot.slane %v1155_v38, %v1102_v6  ;;  %v684_v50 = vrot.slane %v1155_v38, %v1105_v7  ;;  %v781_v51 = vsel %vm226_vm4, %v648_v40, %v640_v35  ;;  %v786_v52 = vsel %vm226_vm4, %v652_v42, %v644_v39 }
  0x35   :  { %v782_v53 = vsel %vm228_vm5, %v656_v43, %v781_v51  ;;  %v787_v54 = vsel %vm228_vm5, %v660_v44, %v786_v52  ;;  %v350_v55 = vrot.slane %v1129_v19, %v1096_v4  ;;  %v354_v56 = vrot.slane %v1129_v19, %v1099_v5 }
  0x36   :  { %540 = vadd.xlane.f32.xlu1 %v539_v41  ;;  %v783_v57 = vsel %vm230_vm6, %v664_v45, %v782_v53  ;;  %v788_v58 = vsel %vm230_vm6, %v668_v46, %v787_v54  ;;  %v358_v59 = vrot.slane %v1137_v24, %v1096_v4  ;;  %v362_v60 = vrot.slane %v1137_v24, %v1099_v5 }
  0x37   :  { %vm527_vm10 = vcmask 1047553   ;;  %v784_v61 = vsel %vm232_vm7, %v672_v47, %v783_v57  ;;  %v789_v62 = vsel %vm232_vm7, %v676_v48, %v788_v58  ;;  %v366_v0 = vrot.slane %v1143_v29, %v1096_v4 }
  0x38   :  { %v370_v11 = vrot.slane %v1143_v29, %v1099_v5  ;;  %v785_v12 = vsel %vm234_vm8, %v680_v49, %v784_v61  ;;  %v790_v13 = vsel %vm234_vm8, %v684_v50, %v789_v62  ;;  %v374_v14 = vrot.slane %v1147_v33, %v1096_v4  ;;  %v1251_v50 = vld [vmem:[#allocation2 + $0x38] sm:$0x77]  ;;  %v1275_v61 = vld [vmem:[#allocation2 + $0x50] sm:$0x77] }
  0x39   :  { %v378_v15 = vrot.slane %v1147_v33, %v1099_v5  ;;  %v818_v16 = vsel %vm817_vm9, %v785_v12, 0.0  ;;  %v819_v17 = vsel %vm817_vm9, %v790_v13, 0.0  ;;  %v382_v18 = vrot.slane %v1149_v34, %v1096_v4  ;;  %v1283_v13 = vld [vmem:[#allocation2 + $0x58] sm:$0x77] }
  0x3a   :  { %v386_v20 = vrot.slane %v1149_v34, %v1099_v5  ;;  %v820_v21 = vadd.f32 %v819_v17, %v818_v16  ;;  %v390_v22 = vrot.slane %v1155_v38, %v1096_v4  ;;  %v394_v23 = vrot.slane %v1155_v38, %v1099_v5 }
  0x3b   :  { %v398_v25 = vrot.slane %v1195_v63, %v1096_v4  ;;  %v402_v26 = vrot.slane %v1195_v63, %v1099_v5  ;;  %v491_v27 = vsel %vm224_vm2, %v358_v59, %v350_v55  ;;  %v497_v28 = vsel %vm224_vm2, %v362_v60, %v354_v56  ;;  %v1263_v55 = vld [vmem:[#allocation2 + $0x40] sm:$0x77]  ;;  %v1271_v59 = vld [vmem:[#allocation2 + $0x48] sm:$0x77] }
  0x3c   :  { %v81_v30 = vrot.slane %v1129_v19, %v1090_v2  ;;  %821 = vadd.xlane.f32.xlu0 %v820_v21  ;;  %v492_v31 = vsel %vm226_vm4, %v366_v0, %v491_v27  ;;  %v498_v32 = vsel %vm226_vm4, %v370_v11, %v497_v28  ;;  %v85_v35 = vrot.slane %v1129_v19, %v1093_v3 }
  0x3d   :  { %v89_v36 = vrot.slane %v1137_v24, %v1090_v2  ;;  %v493_v37 = vsel %vm228_vm5, %v374_v14, %v492_v31  ;;  %v499_v39 = vsel %vm228_vm5, %v378_v15, %v498_v32  ;;  %v93_v40 = vrot.slane %v1137_v24, %v1093_v3  ;;  %v1307_v31 = vld [vmem:[#allocation2 + $0x70] sm:$0x77] }
  0x3e   :  { %v97_v41 = vrot.slane %v1143_v29, %v1090_v2  ;;  %v494_v42 = vsel %vm230_vm6, %v382_v18, %v493_v37  ;;  %v500_v43 = vsel %vm230_vm6, %v386_v20, %v499_v39  ;;  %v101_v19 = vrot.slane %v1143_v29, %v1093_v3  ;;  %v1291_v18 = vld [vmem:[#allocation2 + $0x60] sm:$0x77] }
  0x3f   :  { %v105_v44 = vrot.slane %v1147_v33, %v1090_v2  ;;  %v495_v45 = vsel %vm232_vm7, %v390_v22, %v494_v42  ;;  %v501_v46 = vsel %vm232_vm7, %v394_v23, %v500_v43  ;;  %v109_v24 = vrot.slane %v1147_v33, %v1093_v3 }
  0x40   :  { %v113_v47 = vrot.slane %v1149_v34, %v1090_v2  ;;  %v496_v48 = vsel %vm234_vm8, %v398_v25, %v495_v45  ;;  %v502_v49 = vsel %vm234_vm8, %v402_v26, %v501_v46  ;;  %v117_v29 = vrot.slane %v1149_v34, %v1093_v3  ;;  %v1299_v25 = vld [vmem:[#allocation2 + $0x68] sm:$0x77] }
  0x41   :  { %v121_v51 = vrot.slane %v1155_v38, %v1090_v2  ;;  %v528_v52 = vsel %vm527_vm10, %v496_v48, 0.0  ;;  %v529_v53 = vsel %vm527_vm10, %v502_v49, 0.0  ;;  %v125_v33 = vrot.slane %v1155_v38, %v1093_v3 }
  0x42   :  { %v129_v54 = vrot.slane %v1195_v63, %v1090_v2  ;;  %v530_v56 = vadd.f32 %v529_v53, %v528_v52  ;;  %v133_v57 = vrot.slane %v1195_v63, %v1093_v3  ;;  %v137_v34 = vrot.slane %v1251_v50, %v1090_v2 }
  0x43   :  { %v141_v58 = vrot.slane %v1251_v50, %v1093_v3  ;;  %v223_v60 = vsel %vm222_vm0, %v89_v36, %v81_v30  ;;  %v236_v38 = vsel %vm222_vm0, %v93_v40, %v85_v35  ;;  %v406_v62 = vrot.slane %v1251_v50, %v1096_v4 }
  0x44   :  { %v410_v0 = vrot.slane %v1251_v50, %v1099_v5  ;;  %531 = vadd.xlane.f32.xlu0 %v530_v56  ;;  %v225_v11 = vsel %vm224_vm2, %v97_v41, %v223_v60  ;;  %v237_v12 = vsel %vm224_vm2, %v101_v19, %v236_v38  ;;  %v414_v14 = vrot.slane %v1263_v55, %v1096_v4 }
  0x45   :  { %v418_v15 = vrot.slane %v1263_v55, %v1099_v5  ;;  %v227_v16 = vsel %vm226_vm4, %v105_v44, %v225_v11  ;;  %v238_v17 = vsel %vm226_vm4, %v109_v24, %v237_v12  ;;  %v422_v20 = vrot.slane %v1271_v59, %v1096_v4 }
  0x46   :  { %v426_v21 = vrot.slane %v1271_v59, %v1099_v5  ;;  %v229_v22 = vsel %vm228_vm5, %v113_v47, %v227_v16  ;;  %v239_v23 = vsel %vm228_vm5, %v117_v29, %v238_v17  ;;  %v430_v26 = vrot.slane %v1275_v61, %v1096_v4 }
  0x47   :  { %v434_v27 = vrot.slane %v1275_v61, %v1099_v5  ;;  %v231_v28 = vsel %vm230_vm6, %v121_v51, %v229_v22  ;;  %v240_v30 = vsel %vm230_vm6, %v125_v33, %v239_v23  ;;  %v438_v32 = vrot.slane %v1283_v13, %v1096_v4 }
  0x48   :  { %v442_v35 = vrot.slane %v1283_v13, %v1099_v5  ;;  %v233_v36 = vsel %vm232_vm7, %v129_v54, %v231_v28  ;;  %v241_v37 = vsel %vm232_vm7, %v133_v57, %v240_v30  ;;  %v446_v39 = vrot.slane %v1291_v18, %v1096_v4 }
  0x49   :  { %v450_v40 = vrot.slane %v1291_v18, %v1099_v5  ;;  %v235_v41 = vsel %vm234_vm8, %v137_v34, %v233_v36  ;;  %v242_v42 = vsel %vm234_vm8, %v141_v58, %v241_v37  ;;  %v454_v43 = vrot.slane %v1299_v25, %v1096_v4 }
  0x4a   :  { %v458_v19 = vrot.slane %v1299_v25, %v1099_v5  ;;  %v265_v44 = vadd.f32 %v242_v42, %v235_v41  ;;  %v462_v45 = vrot.slane %v1307_v31, %v1096_v4  ;;  %v466_v46 = vrot.slane %v1307_v31, %v1099_v5 }
  0x4b   :  { %v503_v24 = vsel %vm222_vm0, %v414_v14, %v406_v62  ;;  %v510_v48 = vsel %vm222_vm0, %v418_v15, %v410_v0  ;;  %v688_v49 = vrot.slane %v1195_v63, %v1102_v6  ;;  %v692_v29 = vrot.slane %v1195_v63, %v1105_v7 }
  0x4c   :  { %v504_v47 = vsel %vm224_vm2, %v422_v20, %v503_v24  ;;  %266 = vadd.xlane.f32.xlu1 %v265_v44  ;;  %v511_v52 = vsel %vm224_vm2, %v426_v21, %v510_v48  ;;  %v696_v5 = vrot.slane %v1251_v50, %v1102_v6  ;;  %v700_v53 = vrot.slane %v1251_v50, %v1105_v7 }
  0x4d   :  { %v505_v51 = vsel %vm226_vm4, %v430_v26, %v504_v47  ;;  %v512_v54 = vsel %vm226_vm4, %v434_v27, %v511_v52  ;;  %v704_v56 = vrot.slane %v1263_v55, %v1102_v6  ;;  %v708_v63 = vrot.slane %v1263_v55, %v1105_v7 }
  0x4e   :  { %v506_v33 = vsel %vm228_vm5, %v438_v32, %v505_v51  ;;  %v513_v34 = vsel %vm228_vm5, %v442_v35, %v512_v54  ;;  %v712_v58 = vrot.slane %v1271_v59, %v1102_v6  ;;  %v716_v50 = vrot.slane %v1271_v59, %v1105_v7 }
  0x4f   :  { %v507_v57 = vsel %vm230_vm6, %v446_v39, %v506_v33  ;;  %v514_v38 = vsel %vm230_vm6, %v450_v40, %v513_v34  ;;  %v720_v62 = vrot.slane %v1275_v61, %v1102_v6  ;;  %v724_v0 = vrot.slane %v1275_v61, %v1105_v7 }
  0x50   :  { %v508_v60 = vsel %vm232_vm7, %v454_v43, %v507_v57  ;;  %v515_v12 = vsel %vm232_vm7, %v458_v19, %v514_v38  ;;  %v728_v14 = vrot.slane %v1283_v13, %v1102_v6  ;;  %v732_v15 = vrot.slane %v1283_v13, %v1105_v7 }
  0x51   :  { %v509_v11 = vsel %vm234_vm8, %v462_v45, %v508_v60  ;;  %v516_v16 = vsel %vm234_vm8, %v466_v46, %v515_v12  ;;  %v736_v17 = vrot.slane %v1291_v18, %v1102_v6  ;;  %v740_v20 = vrot.slane %v1291_v18, %v1105_v7 }
  0x52   :  { %v744_v21 = vrot.slane %v1299_v25, %v1102_v6  ;;  %v533_v22 = vadd.f32 %v516_v16, %v509_v11  ;;  %v748_v23 = vrot.slane %v1299_v25, %v1105_v7  ;;  %v791_v26 = vsel %vm222_vm0, %v696_v5, %v688_v49 }
  0x53   :  { %v798_v27 = vsel %vm222_vm0, %v700_v53, %v692_v29  ;;  %v792_v28 = vsel %vm224_vm2, %v704_v56, %v791_v26  ;;  %v145_v32 = vrot.slane %v1263_v55, %v1090_v2  ;;  %v149_v35 = vrot.slane %v1263_v55, %v1093_v3 }
  0x54   :  { %v799_v30 = vsel %vm224_vm2, %v708_v63, %v798_v27  ;;  %534 = vadd.xlane.f32.xlu0 %v533_v22  ;;  %v793_v36 = vsel %vm226_vm4, %v712_v58, %v792_v28  ;;  %v153_v39 = vrot.slane %v1271_v59, %v1090_v2  ;;  %v157_v40 = vrot.slane %v1271_v59, %v1093_v3 }
  0x55   :  { %v800_v37 = vsel %vm226_vm4, %v716_v50, %v799_v30  ;;  %v794_v41 = vsel %vm228_vm5, %v720_v62, %v793_v36  ;;  %v161_v43 = vrot.slane %v1275_v61, %v1090_v2  ;;  %v165_v55 = vrot.slane %v1275_v61, %v1093_v3 }
  0x56   :  { %v801_v42 = vsel %vm228_vm5, %v724_v0, %v800_v37  ;;  %v795_v19 = vsel %vm230_vm6, %v728_v14, %v794_v41  ;;  %v169_v45 = vrot.slane %v1283_v13, %v1090_v2  ;;  %v173_v59 = vrot.slane %v1283_v13, %v1093_v3  ;;  %v59_v37 = vld [vmem:[%s1629_s2] sm:$0xf]  ;;  %s1040_s2 = smov [#allocation7]  }
  0x57   :  { %v802_v44 = vsel %vm230_vm6, %v732_v15, %v801_v42  ;;  %vm826_vm11 = vcmask 1043456   ;;  %v796_v46 = vsel %vm232_vm7, %v736_v17, %v795_v19  ;;  %v177_v47 = vrot.slane %v1291_v18, %v1090_v2  ;;  %v546_v19 = vld [vmem:[#allocation5 + $0x1] ss:$4 sm:$0xf]  ;;  %s944_s11 = sshll.u32 %s1040_s2, 4  ;;  %s945_s11 = int_to_ptr.vmem [resolvable:$true] %s944_s11 }
  0x58   :  { %v803_v24 = vsel %vm232_vm7, %v740_v20, %v802_v44  ;;  %v181_v61 = vrot.slane %v1291_v18, %v1093_v3  ;;  %v797_v48 = vsel %vm234_vm8, %v744_v21, %v796_v46  ;;  %v185_v29 = vrot.slane %v1299_v25, %v1090_v2  ;;  %s1008_s12 = scalar_lea.vmem %s945_s11, 1536  ;;  %p1013_p3 = scmp.lt.s32.totalorder %s945_s11, %s945_s11 }
  0x59   :  { %v804_v49 = vsel %vm234_vm8, %v748_v23, %v803_v24  ;;  %v189_v13 = vrot.slane %v1299_v25, %v1093_v3  ;;  %v193_v52 = vrot.slane %v1307_v31, %v1090_v2  ;;  %v197_v5 = vrot.slane %v1307_v31, %v1093_v3  ;;  %p1009_p2 = scmp.ne.s32.totalorder %s945_s11, %s1008_s12  ;;  %p1014_p4 = scmp.lt.s32.totalorder %s1008_s12, %s1008_s12 }
  0x5a   :  { %v823_v51 = vadd.f32 %v804_v49, %v797_v48  ;;  %v201_v18 = vrot.slane %v1111_v10, %v1090_v2  ;;  %v205_v53 = vrot.slane %v1111_v10, %v1093_v3  ;;  %v243_v33 = vsel %vm222_vm0, %v153_v39, %v145_v32  ;;  %v280_v32 = vld [vmem:[#allocation5] ss:$4 sm:$0xf] }
  0x5b   :  { %v250_v54 = vsel %vm222_vm0, %v157_v40, %v149_v35  ;;  %v752_v25 = vrot.slane %v1307_v31, %v1102_v6  ;;  %v244_v56 = vsel %vm224_vm2, %v161_v43, %v243_v33  ;;  %v756_v57 = vrot.slane %v1307_v31, %v1105_v7  ;;  %p1015_p5 = por %p1014_p4, %p1013_p3 }
  0x5c   :  { %824 = vadd.xlane.f32.xlu1 %v823_v51  ;;  %v251_v63 = vsel %vm224_vm2, %v165_v55, %v250_v54  ;;  %v760_v34 = vrot.slane %v1111_v10, %v1102_v6  ;;  %v245_v3 = vsel %vm226_vm4, %v169_v45, %v244_v56  ;;  %v764_v50 = vrot.slane %v1111_v10, %v1105_v7 }
  0x5d   :  { %v252_v58 = vsel %vm226_vm4, %v173_v59, %v251_v63  ;;  %v768_v60 = vrot.slane %v1107_v8, %v1102_v6  ;;  %v246_v38 = vsel %vm228_vm5, %v177_v47, %v245_v3  ;;  %v772_v31 = vrot.slane %v1107_v8, %v1105_v7  ;;  %v836_v59 = vld [vmem:[#allocation5 + $0x2] ss:$4 sm:$0xf]  ;;  %p1016_p6 = pnand %p1015_p5, %p1009_p2 }
  0x5e   :  { %v253_v62 = vsel %vm228_vm5, %v181_v61, %v252_v58  ;;  %v776_v0 = vrot.slane %v1109_v9, %v1102_v6  ;;  %v247_v11 = vsel %vm230_vm6, %v185_v29, %v246_v38  ;;  %v780_v10 = vrot.slane %v1109_v9, %v1105_v7 }
  0x5f   :  { %v254_v12 = vsel %vm230_vm6, %v189_v13, %v253_v62  ;;  %v805_v14 = vsel %vm222_vm0, %v760_v34, %v752_v25  ;;  %v248_v15 = vsel %vm232_vm7, %v193_v52, %v247_v11  ;;  %v808_v8 = vsel %vm222_vm0, %v764_v50, %v756_v57 }
  0x60   :  { %v255_v16 = vsel %vm232_vm7, %v197_v5, %v254_v12  ;;  %v806_v17 = vsel %vm224_vm2, %v768_v60, %v805_v14  ;;  %v249_v20 = vsel %vm234_vm8, %v201_v18, %v248_v15  ;;  %v809_v23 = vsel %vm224_vm2, %v772_v31, %v808_v8 }
  0x61   :  { %v256_v21 = vsel %vm234_vm8, %v205_v53, %v255_v16  ;;  %v807_v22 = vsel %vm226_vm4, %v776_v0, %v806_v17  ;;  %v810_v7 = vsel %vm226_vm4, %v780_v10, %v809_v23  ;;  %v296_v36 = vsub.s32 3, %v1087_v1 }
  0x62   :  { %v268_v26 = vadd.f32 %v256_v21, %v249_v20  ;;  %v827_v9 = vsel %vm826_vm11, %v807_v22, 0.0  ;;  %v828_v27 = vsel %vm826_vm11, %v810_v7, 0.0  ;;  %v1464_v39 = vrot.slane %v280_v32, %v1090_v2 }
  0x63   :  { %v829_v28 = vadd.f32 %v828_v27, %v827_v9  ;;  %v1467_v40 = vrot.slane %v280_v32, %v1096_v4  ;;  %v1470_v41 = vrot.slane %v280_v32, %v1102_v6  ;;  %v1472_v55 = vrot.slane %v280_v32, %v296_v36 }
  0x64   :  { %269 = vadd.xlane.f32.xlu0 %v268_v26  ;;  %v1475_v1 = vrot.slane %v59_v37, %v1090_v2  ;;  %v1478_v44 = vrot.slane %v59_v37, %v1096_v4  ;;  %v1481_v45 = vrot.slane %v59_v37, %v1102_v6  ;;  %v1483_v24 = vrot.slane %v59_v37, %v296_v36 }
  0x65   :  { %v551_v29 = vrot.slane %v546_v19, %v1090_v2  ;;  %v555_v13 = vrot.slane %v546_v19, %v1096_v4  ;;  %v559_v52 = vrot.slane %v546_v19, %v1102_v6  ;;  %v563_v5 = vrot.slane %v546_v19, %v296_v36 }
  0x66   :  { %v1493_v18 = vrot.slane %v836_v59, %v1090_v2  ;;  %v1496_v54 = vrot.slane %v836_v59, %v1096_v4  ;;  %v1499_v25 = vrot.slane %v836_v59, %v1102_v6  ;;  %v1501_v56 = vrot.slane %v836_v59, %v296_v36 }
  0x67   :  { %vm592_vm12 = vcmask 1046528   ;;  %vm882_vm13 = vcmask 1045504  }
  0x68   :  { %830 = vadd.xlane.f32.xlu0 %v829_v28 }
  0xbf   :  { %v276_v30 = vpop.xlane.xlu1 %275 }
  0xc0   :  { %v279_v42 = vmul.f32 0.00390625, %v276_v30 }
  0xc2   :  { %v310_v47 = vmul.f32 %v1464_v39, %v279_v42  ;;  %v311_v61 = vmul.f32 %v1467_v40, %v279_v42  ;;  %v312_v48 = vmul.f32 %v1470_v41, %v279_v42  ;;  %v313_v49 = vmul.f32 %v1472_v55, %v279_v42 }
  0xc3   :  { %v541_v43 = vpop.xlane.xlu1 %540 }
  0xc4   :  { %v544_v51 = vmul.f32 0.00390625, %v541_v43  ;;  %v1504_v57 = vadd.f32 %v1475_v1, %v310_v47  ;;  %v1507_v34 = vadd.f32 %v1478_v44, %v311_v61  ;;  %v1510_v2 = vadd.f32 %v1481_v45, %v312_v48 }
  0xc5   :  { %v1513_v3 = vadd.f32 %v1483_v24, %v313_v49 }
  0xc6   :  { %v1515_v4 = vmul.f32 %v551_v29, %v544_v51  ;;  %v1517_v6 = vmul.f32 %v555_v13, %v544_v51  ;;  %v1519_v60 = vmul.f32 %v559_v52, %v544_v51  ;;  %v1521_v38 = vmul.f32 %v563_v5, %v544_v51 }
  0xc9   :  { %v822_v35 = vpop.xlane.xlu0 %821 }
  0xca   :  { %v832_v58 = vmul.f32 0.00390625, %v822_v35 }
  0xcc   :  { %v858_v8 = vmul.f32 %v1493_v18, %v832_v58  ;;  %v859_v27 = vmul.f32 %v1496_v54, %v832_v58  ;;  %v860_v28 = vmul.f32 %v1499_v25, %v832_v58  ;;  %v861_v30 = vmul.f32 %v1501_v56, %v832_v58 }
  0xce   :  { %v886_v51 = vrot.slane %v859_v27, 2  ;;  %v611_v27 = vrot.slane %v1521_v38, 1 }
  0xd1   :  { %v532_v46 = vpop.xlane.xlu0 %531 }
  0xd2   :  { %v542_v53 = vmul.f32 0.00390625, %v532_v46 }
  0xd4   :  { %v568_v62 = vmul.f32 %v551_v29, %v542_v53  ;;  %v569_v0 = vmul.f32 %v555_v13, %v542_v53  ;;  %v570_v11 = vmul.f32 %v559_v52, %v542_v53  ;;  %v571_v12 = vmul.f32 %v563_v5, %v542_v53 }
  0xd6   :  { %v593_v32 = vrot.slane %v568_v62, 1  ;;  %v596_v35 = vrot.slane %v569_v0, 1  ;;  %v599_v36 = vrot.slane %v570_v11, 1  ;;  %v602_v37 = vrot.slane %v571_v12, 1 }
  0xd9   :  { %v267_v33 = vpop.xlane.xlu1 %266 }
  0xda   :  { %v277_v63 = vmul.f32 0.00390625, %v267_v33 }
  0xdc   :  { %v302_v10 = vmul.f32 %v1464_v39, %v277_v63  ;;  %v303_v20 = vmul.f32 %v1467_v40, %v277_v63  ;;  %v304_v21 = vmul.f32 %v1470_v41, %v277_v63  ;;  %v305_v22 = vmul.f32 %v1472_v55, %v277_v63 }
  0xde   :  { %v335_v42 = vadd.f32 %v1475_v1, %v302_v10  ;;  %v336_v19 = vadd.f32 %v1478_v44, %v303_v20  ;;  %v337_v59 = vadd.f32 %v1481_v45, %v304_v21  ;;  %v338_v46 = vadd.f32 %v1483_v24, %v305_v22 }
  0xdf   :  { %v605_v20 = vrot.slane %v1515_v4, 1  ;;  %v607_v21 = vrot.slane %v1517_v6, 1  ;;  %v609_v22 = vrot.slane %v1519_v60, 1 }
  0xe1   :  { %v535_v50 = vpop.xlane.xlu0 %534  ;;  %v633_v6 = vadd.f32 %v605_v20, %v1504_v57 }
  0xe2   :  { %v543_v31 = vmul.f32 0.00390625, %v535_v50 }
  0xe4   :  { %v1524_v14 = vmul.f32 %v551_v29, %v543_v31  ;;  %v1526_v15 = vmul.f32 %v555_v13, %v543_v31  ;;  %v1528_v16 = vmul.f32 %v559_v52, %v543_v31  ;;  %v1530_v17 = vmul.f32 %v563_v5, %v543_v31 }
  0xe5   :  { %v883_v13 = vrot.slane %v858_v8, 2  ;;  %v889_v52 = vrot.slane %v860_v28, 2  ;;  %v892_v5 = vrot.slane %v861_v30, 2 }
  0xe6   :  { %v594_v23 = vrot.slane %v1524_v14, 1  ;;  %v597_v26 = vrot.slane %v1526_v15, 1  ;;  %v600_v7 = vrot.slane %v1528_v16, 1  ;;  %v603_v9 = vrot.slane %v1530_v17, 1 }
  0xe8   :  { %v595_v47 = vsel %vm592_vm12, %v593_v32, %v594_v23  ;;  %v598_v61 = vsel %vm592_vm12, %v596_v35, %v597_v26  ;;  %v601_v48 = vsel %vm592_vm12, %v599_v36, %v600_v7  ;;  %v604_v49 = vsel %vm592_vm12, %v602_v37, %v603_v9 }
  0xe9   :  { %v825_v43 = vpop.xlane.xlu1 %824  ;;  %v625_v50 = vadd.f32 %v595_v47, %v335_v42  ;;  %v626_v62 = vadd.f32 %v598_v61, %v336_v19  ;;  %v627_v31 = vadd.f32 %v601_v48, %v337_v59  ;;  %v628_v0 = vadd.f32 %v604_v49, %v338_v46 }
  0xea   :  { %v833_v29 = vmul.f32 0.00390625, %v825_v43  ;;  %v634_v61 = vadd.f32 %v607_v21, %v1507_v34  ;;  %v635_v48 = vadd.f32 %v609_v22, %v1510_v2  ;;  %v636_v49 = vadd.f32 %v611_v27, %v1513_v3 }
  0xeb   :  { %v606_v2 = vsel %vm592_vm12, %v594_v23, %v605_v20 }
  0xec   :  { %v1560_v53 = vmul.f32 %v1493_v18, %v833_v29  ;;  %v1563_v33 = vmul.f32 %v1496_v54, %v833_v29  ;;  %v1566_v63 = vmul.f32 %v1499_v25, %v833_v29  ;;  %v1569_v58 = vmul.f32 %v1501_v56, %v833_v29 }
  0xee   :  { %v884_v11 = vrot.slane %v1560_v53, 2  ;;  %v887_v12 = vrot.slane %v1563_v33, 2  ;;  %v890_v10 = vrot.slane %v1566_v63, 2  ;;  %v893_v8 = vrot.slane %v1569_v58, 2 }
  0xf0   :  { %v885_v28 = vsel %vm882_vm13, %v883_v13, %v884_v11  ;;  %v888_v30 = vsel %vm882_vm13, %v886_v51, %v887_v12  ;;  %v891_v32 = vsel %vm882_vm13, %v889_v52, %v890_v10  ;;  %v894_v35 = vsel %vm882_vm13, %v892_v5, %v893_v8 }
  0xf1   :  { %v270_v36 = vpop.xlane.xlu0 %269  ;;  %v915_v37 = vadd.f32 %v885_v28, %v625_v50  ;;  %v916_v42 = vadd.f32 %v888_v30, %v626_v62  ;;  %v917_v43 = vadd.f32 %v891_v32, %v627_v31  ;;  %v918_v19 = vadd.f32 %v894_v35, %v628_v0 }
  0xf2   :  { %v278_v4 = vmul.f32 0.00390625, %v270_v36 }
  0xf3   :  { %927 = vst [vmem:[#allocation7] sm:$0xff] %v915_v37  ;;  %928 = vst [vmem:[#allocation7 + $0x8] sm:$0xff] %v916_v42 }
  0xf4   :  { %929 = vst [vmem:[#allocation7 + $0x10] sm:$0xff] %v917_v43  ;;  %930 = vst [vmem:[#allocation7 + $0x18] sm:$0xff] %v918_v19  ;;  %v306_v60 = vmul.f32 %v1464_v39, %v278_v4  ;;  %v307_v38 = vmul.f32 %v1467_v40, %v278_v4  ;;  %v308_v59 = vmul.f32 %v1470_v41, %v278_v4 }
  0xf5   :  { %v309_v46 = vmul.f32 %v1472_v55, %v278_v4  ;;  %v831_v47 = vpop.xlane.xlu0 %830 }
  0xf6   :  { %v834_v57 = vmul.f32 0.00390625, %v831_v47  ;;  %v339_v29 = vadd.f32 %v1475_v1, %v306_v60  ;;  %v340_v13 = vadd.f32 %v1478_v44, %v307_v38  ;;  %v341_v39 = vadd.f32 %v1481_v45, %v308_v59 }
  0xf7   :  { %v342_v40 = vadd.f32 %v1483_v24, %v309_v46  ;;  %v608_v1 = vsel %vm592_vm12, %v597_v26, %v607_v21  ;;  %v610_v44 = vsel %vm592_vm12, %v600_v7, %v609_v22  ;;  %v612_v45 = vsel %vm592_vm12, %v603_v9, %v611_v27 }
  0xf8   :  { %v866_v41 = vmul.f32 %v1493_v18, %v834_v57  ;;  %v867_v55 = vmul.f32 %v1496_v54, %v834_v57  ;;  %v868_v51 = vmul.f32 %v1499_v25, %v834_v57  ;;  %v869_v34 = vmul.f32 %v1501_v56, %v834_v57 }
  0xf9   :  { %v629_v56 = vadd.f32 %v606_v2, %v339_v29  ;;  %v630_v3 = vadd.f32 %v608_v1, %v340_v13  ;;  %v631_v14 = vadd.f32 %v610_v44, %v341_v39  ;;  %v632_v23 = vadd.f32 %v612_v45, %v342_v40 }
  0xfa   :  { %v895_v24 = vrot.slane %v866_v41, 2  ;;  %v897_v18 = vrot.slane %v867_v55, 2  ;;  %v899_v54 = vrot.slane %v868_v51, 2  ;;  %v901_v25 = vrot.slane %v869_v34, 2 }
  0xfc   :  { %v896_v15 = vsel %vm882_vm13, %v884_v11, %v895_v24  ;;  %v898_v16 = vsel %vm882_vm13, %v887_v12, %v897_v18  ;;  %v900_v26 = vsel %vm882_vm13, %v890_v10, %v899_v54  ;;  %v902_v17 = vsel %vm882_vm13, %v893_v8, %v901_v25 }
  0xfd   :  { %v919_v7 = vadd.f32 %v896_v15, %v629_v56  ;;  %v920_v9 = vadd.f32 %v898_v16, %v630_v3  ;;  %v921_v52 = vadd.f32 %v900_v26, %v631_v14  ;;  %v922_v5 = vadd.f32 %v902_v17, %v632_v23 }
  0xfe   :  { %v923_v53 = vadd.f32 %v895_v24, %v633_v6  ;;  %v924_v33 = vadd.f32 %v897_v18, %v634_v61  ;;  %v925_v63 = vadd.f32 %v899_v54, %v635_v48  ;;  %v926_v58 = vadd.f32 %v901_v25, %v636_v49 }
  0xff   :  { %931 = vst [vmem:[#allocation7 + $0x20] sm:$0xff] %v919_v7  ;;  %932 = vst [vmem:[#allocation7 + $0x28] sm:$0xff] %v920_v9 }
 0x100   :  { %933 = vst [vmem:[#allocation7 + $0x30] sm:$0xff] %v921_v52  ;;  %934 = vst [vmem:[#allocation7 + $0x38] sm:$0xff] %v922_v5 }
 0x101   :  { %935 = vst [vmem:[#allocation7 + $0x40] sm:$0x3] %v923_v53  ;;  %936 = vst [vmem:[#allocation7 + $0x48] sm:$0x3] %v924_v33 }
 0x102   :  { %937 = vst [vmem:[#allocation7 + $0x50] sm:$0x3] %v925_v63  ;;  %938 = vst [vmem:[#allocation7 + $0x58] sm:$0x3] %v926_v58 }
 0x103   :  { %1019 = shalt.err (!%p1016_p6)
}
 0x104   :  { %s1020_s15 = scalar_lea.hbm %s1630_s3, 1536 }
 0x105   :  { %p1021_p7 = scmp.ne.s32.totalorder %s1630_s3, %s1020_s15  ;;  %p1024_p8 = scmp.lt.u32.totalorder %s1020_s15, %s1630_s3 }
 0x107   :  { %p1026_p9 = pnand %p1024_p8, %p1021_p7 }
 0x109   :  { %1029 = shalt.err (!%p1026_p9)
}
 0x10a   :  { %s1041_s20 = smov 512   ;;  %s1042_s21 = smov 32  }
 0x10b   :  { %950 = dma.vmem_to_hbm [thread:$0]  %s945_s11, 1536, %s1630_s3, [#allocation4], %s1041_s20, %s1041_s20, %s1042_s21  }
 0x10c   :  { %1034 = dma.done.wait [#allocation4], 1536  }
 0x10d   :  { %1035 = vsyncadd [#allocation4], 4294965760 }
 0x10e   :  { %954 = vsyncpa [#allocation3], 1 }
 0x10f   :  { %955 = vsyncpa [#allocation6], 1 }
 0x110   :  { %956 = vsyncpa [#allocation4], 1 }

</bundles_post_ra>
